<compile_context>
chip_gen: v5e
topology: v5e:2x2
jax: 0.10.0
libtpu: 0.0.40
codegen_flags: <defaults>
</compile_context>

<pallas_src>
import jax
import jax.numpy as jnp
from jax.experimental import pallas as pl
from jax.experimental.pallas import tpu as pltpu


def ucann_kernel(x_ref, w1_ref, b1_ref, w2_ref, b2_ref, w3_ref, b3_ref, o_ref):
    # Layer 1: Linear(input_dim -> hidden_dim) + ReLU (f32 accumulation)
    h1 = jnp.dot(x_ref[...], w1_ref[...], preferred_element_type=jnp.float32)
    h1 = jnp.maximum(h1 + b1_ref[...], 0.0)

    # Layer 2: Linear(hidden_dim -> hidden_dim) + ReLU
    h2 = jnp.dot(h1.astype(w2_ref.dtype), w2_ref[...],
                 preferred_element_type=jnp.float32)
    h2 = jnp.maximum(h2 + b2_ref[...], 0.0)

    # Layer 3: Linear(hidden_dim -> output_dim) + Sigmoid
    h3 = jnp.dot(h2.astype(w3_ref.dtype), w3_ref[...],
                 preferred_element_type=jnp.float32)
    h3 = h3 + b3_ref[...]
    # sigmoid lowers to the EUP; VALU slots stay free for bias adds / ReLUs.
    o_ref[...] = jax.nn.sigmoid(h3).astype(o_ref.dtype)


def _round_up(x, m):
    return ((x + m - 1) // m) * m


def _select_tile(n_rows, use_bf16):
    # Target ~0.5-1 us of x DMA per grid step (x row = 32 * {2,4} bytes), but
    # keep at least 2 grid steps when possible so both v7x TensorCores get work.
    target_rows = 16384 if use_bf16 else 8192
    tile = min(target_rows, _round_up(pl.cdiv(n_rows, 2), 8))
    return max(tile, 8)


def ucann_forward(x, edge_index, params, *, use_bf16=True, tile_rows=None):
    """Forward pass. edge_index is ignored, exactly like the PyTorch module."""
    del edge_index
    w1, b1, w2, b2, w3, b3 = params
    N, in_dim = x.shape
    out_dim = w3.shape[1]

    if use_bf16:
        # Halve x / weight HBM + VMEM traffic; accumulation stays f32 in-kernel.
        x = x.astype(jnp.bfloat16)
        w1 = w1.astype(jnp.bfloat16)
        w2 = w2.astype(jnp.bfloat16)
        w3 = w3.astype(jnp.bfloat16)

    tile = tile_rows if tile_rows is not None else _select_tile(N, use_bf16)
    tile = max(8, _round_up(tile, 8))           # sublane-aligned row tile
    grid = (pl.cdiv(N, tile),)                  # partial tail block is masked by Pallas

    def const_spec(arr):
        shape = arr.shape
        # Whole-array block, same block index every step -> stays VMEM-resident.
        return pl.BlockSpec(shape, lambda i, _s=shape: (0,) * len(_s))

    out = pl.pallas_call(
        ucann_kernel,
        out_shape=jax.ShapeDtypeStruct((N, out_dim), jnp.float32),
        grid=grid,
        in_specs=[
            pl.BlockSpec((tile, in_dim), lambda i: (i, 0)),
            const_spec(w1), const_spec(b1),
            const_spec(w2), const_spec(b2),
            const_spec(w3), const_spec(b3),
        ],
        out_specs=pl.BlockSpec((tile, out_dim), lambda i: (i, 0)),
        compiler_params=pltpu.CompilerParams(
            dimension_semantics=("parallel",),
        ),
    )(x, w1, b1, w2, b2, w3, b3)
    return out


def init_params(key, input_dim=32, hidden_dim=24, output_dim=12):
    """Deterministic init mimicking torch.nn.Linear (uniform in +/- 1/sqrt(fan_in))."""
    def linear(key, fan_in, fan_out):
        kw, kb = jax.random.split(key)
        bound = 1.0 / jnp.sqrt(jnp.float32(fan_in))
        # stored as (in, out) so the kernel computes x @ W
        w = jax.random.uniform(kw, (fan_in, fan_out), jnp.float32, -bound, bound)
        b = jax.random.uniform(kb, (1, fan_out), jnp.float32, -bound, bound)
        return w, b

    k1, k2, k3 = jax.random.split(key, 3)
    w1, b1 = linear(k1, input_dim, hidden_dim)
    w2, b2 = linear(k2, hidden_dim, hidden_dim)
    w3, b3 = linear(k3, hidden_dim, output_dim)
    return (w1, b1, w2, b2, w3, b3)


def _reference(x, params):
    w1, b1, w2, b2, w3, b3 = params
    h = jnp.maximum(x @ w1 + b1, 0.0)
    h = jnp.maximum(h @ w2 + b2, 0.0)
    return jax.nn.sigmoid(h @ w3 + b3)


if __name__ == "__main__":
    key = jax.random.PRNGKey(0)
    kx, kp, ke, kx2 = jax.random.split(key, 4)

    input_dim, hidden_dim, output_dim = 32, 24, 12
    params = init_params(kp, input_dim, hidden_dim, output_dim)

    # Small case matching the module's intended graph-node input (N=8 nodes).
    num_nodes = 8
    x = jax.random.normal(kx, (num_nodes, input_dim), dtype=jnp.float32)
    edge_index = jax.random.randint(ke, (2, 16), 0, num_nodes, dtype=jnp.int32)
    ref = _reference(x, params)

    # f32 path: bit-tight correctness check.
    out_f32 = jax.block_until_ready(
        ucann_forward(x, edge_index, params, use_bf16=False))
    assert out_f32.shape == (num_nodes, output_dim)
    assert jnp.allclose(out_f32, ref, atol=1e-5, rtol=1e-5)

    # Default bf16-streaming path: looser tolerance (sigmoid outputs in [0,1]).
    out_bf16 = jax.block_until_ready(ucann_forward(x, edge_index, params))
    assert out_bf16.shape == (num_nodes, output_dim)
    assert jnp.allclose(out_bf16, ref, atol=2.5e-2, rtol=0)

    # Larger, non-multiple-of-tile case: exercises the cdiv grid + Pallas
    # masked partial tail block (tile=504 -> 2 grid steps, last one partial).
    num_nodes2 = 1000
    x2 = jax.random.normal(kx2, (num_nodes2, input_dim), dtype=jnp.float32)
    ref2 = _reference(x2, params)

    out2_f32 = jax.block_until_ready(
        ucann_forward(x2, edge_index, params, use_bf16=False))
    assert out2_f32.shape == (num_nodes2, output_dim)
    assert jnp.allclose(out2_f32, ref2, atol=1e-5, rtol=1e-5)

    out2 = jax.block_until_ready(ucann_forward(x2, edge_index, params))
    assert out2.shape == (num_nodes2, output_dim)
    assert jnp.allclose(out2, ref2, atol=2.5e-2, rtol=0)

    print("KERNEL_OK")
</pallas_src>

<mosaic_0001>
module attributes {stable_mosaic.version = 11 : i64} {
  func.func @ucann_kernel(%arg0: i32, %arg1: memref<8x32xf32, #tpu.memory_space<vmem>>, %arg2: memref<32x24xf32, #tpu.memory_space<vmem>>, %arg3: memref<1x24xf32, #tpu.memory_space<vmem>>, %arg4: memref<24x24xf32, #tpu.memory_space<vmem>>, %arg5: memref<1x24xf32, #tpu.memory_space<vmem>>, %arg6: memref<24x12xf32, #tpu.memory_space<vmem>>, %arg7: memref<1x12xf32, #tpu.memory_space<vmem>>, %arg8: memref<8x12xf32, #tpu.memory_space<vmem>>) attributes {dimension_semantics = [#tpu.dimension_semantics<parallel>], iteration_bounds = array<i64: 1>, scalar_prefetch = 0 : i64, scratch_operands = 0 : i64, tpu.core_type = #tpu.core_type<tc>, window_params = [{transform_indices = @transform_0, window_bounds = array<i64: 8, 32>}, {pipeline_mode = #tpu.pipeline_mode<synchronous>, transform_indices = @transform_1, window_bounds = array<i64: 32, 24>}, {pipeline_mode = #tpu.pipeline_mode<synchronous>, transform_indices = @transform_2, window_bounds = array<i64: 1, 24>}, {pipeline_mode = #tpu.pipeline_mode<synchronous>, transform_indices = @transform_3, window_bounds = array<i64: 24, 24>}, {pipeline_mode = #tpu.pipeline_mode<synchronous>, transform_indices = @transform_4, window_bounds = array<i64: 1, 24>}, {pipeline_mode = #tpu.pipeline_mode<synchronous>, transform_indices = @transform_5, window_bounds = array<i64: 24, 12>}, {pipeline_mode = #tpu.pipeline_mode<synchronous>, transform_indices = @transform_6, window_bounds = array<i64: 1, 12>}, {transform_indices = @transform_7, window_bounds = array<i64: 8, 12>}]} {
    %c0 = arith.constant 0 : index
    %c0_0 = arith.constant 0 : index
    %0 = vector.load %arg1[%c0, %c0_0] : memref<8x32xf32, #tpu.memory_space<vmem>>, vector<8x32xf32>
    %c0_1 = arith.constant 0 : index
    %c0_2 = arith.constant 0 : index
    %1 = vector.load %arg2[%c0_1, %c0_2] : memref<32x24xf32, #tpu.memory_space<vmem>>, vector<32x24xf32>
    %cst = arith.constant dense<0.000000e+00> : vector<8x24xf32>
    %2 = tpu.matmul %0, %1, %cst {dimension_numbers = #tpu.dot_dimension_numbers<[1], [0], [0], [1], [0, 0, 1, 1], [], []>} : vector<8x32xf32>, vector<32x24xf32>, vector<8x24xf32> -> vector<8x24xf32>
    %c0_3 = arith.constant 0 : index
    %c0_4 = arith.constant 0 : index
    %3 = vector.load %arg3[%c0_3, %c0_4] : memref<1x24xf32, #tpu.memory_space<vmem>>, vector<1x24xf32>
    %4 = vector.broadcast %3 : vector<1x24xf32> to vector<8x24xf32>
    %5 = arith.addf %2, %4 : vector<8x24xf32>
    %cst_5 = arith.constant 0.000000e+00 : f32
    %6 = vector.broadcast %cst_5 : f32 to vector<8x24xf32>
    %7 = arith.maximumf %5, %6 : vector<8x24xf32>
    %c0_6 = arith.constant 0 : index
    %c0_7 = arith.constant 0 : index
    %8 = vector.load %arg4[%c0_6, %c0_7] : memref<24x24xf32, #tpu.memory_space<vmem>>, vector<24x24xf32>
    %cst_8 = arith.constant dense<0.000000e+00> : vector<8x24xf32>
    %9 = tpu.matmul %7, %8, %cst_8 {dimension_numbers = #tpu.dot_dimension_numbers<[1], [0], [0], [1], [0, 0, 1, 1], [], []>} : vector<8x24xf32>, vector<24x24xf32>, vector<8x24xf32> -> vector<8x24xf32>
    %c0_9 = arith.constant 0 : index
    %c0_10 = arith.constant 0 : index
    %10 = vector.load %arg5[%c0_9, %c0_10] : memref<1x24xf32, #tpu.memory_space<vmem>>, vector<1x24xf32>
    %11 = vector.broadcast %10 : vector<1x24xf32> to vector<8x24xf32>
    %12 = arith.addf %9, %11 : vector<8x24xf32>
    %cst_11 = arith.constant 0.000000e+00 : f32
    %13 = vector.broadcast %cst_11 : f32 to vector<8x24xf32>
    %14 = arith.maximumf %12, %13 : vector<8x24xf32>
    %c0_12 = arith.constant 0 : index
    %c0_13 = arith.constant 0 : index
    %15 = vector.load %arg6[%c0_12, %c0_13] : memref<24x12xf32, #tpu.memory_space<vmem>>, vector<24x12xf32>
    %cst_14 = arith.constant dense<0.000000e+00> : vector<8x12xf32>
    %16 = tpu.matmul %14, %15, %cst_14 {dimension_numbers = #tpu.dot_dimension_numbers<[1], [0], [0], [1], [0, 0, 1, 1], [], []>} : vector<8x24xf32>, vector<24x12xf32>, vector<8x12xf32> -> vector<8x12xf32>
    %c0_15 = arith.constant 0 : index
    %c0_16 = arith.constant 0 : index
    %17 = vector.load %arg7[%c0_15, %c0_16] : memref<1x12xf32, #tpu.memory_space<vmem>>, vector<1x12xf32>
    %18 = vector.broadcast %17 : vector<1x12xf32> to vector<8x12xf32>
    %19 = arith.addf %16, %18 : vector<8x12xf32>
    %20 = arith.negf %19 : vector<8x12xf32>
    %21 = math.exp %20 : vector<8x12xf32>
    %cst_17 = arith.constant 1.000000e+00 : f32
    %22 = vector.broadcast %cst_17 : f32 to vector<8x12xf32>
    %23 = arith.addf %22, %21 : vector<8x12xf32>
    %24 = arith.divf %22, %23 : vector<8x12xf32>
    %c0_18 = arith.constant 0 : index
    %c0_19 = arith.constant 0 : index
    %25 = vector.load %arg8[%c0_18, %c0_19] : memref<8x12xf32, #tpu.memory_space<vmem>>, vector<8x12xf32>
    tpu.vector_store %arg8[%c0_18, %c0_19], %24 {strides = array<i32>} : memref<8x12xf32, #tpu.memory_space<vmem>>, vector<8x12xf32>,
    return
  }
  func.func @transform_0(%arg0: i32) -> (i32, i32) {
    %c0_i32 = arith.constant 0 : i32
    %c0_i32_0 = arith.constant 0 : i32
    return %arg0, %c0_i32 : i32, i32
  }
  func.func @transform_1(%arg0: i32) -> (i32, i32) {
    %c0_i32 = arith.constant 0 : i32
    %c0_i32_0 = arith.constant 0 : i32
    %c0_i32_1 = arith.constant 0 : i32
    return %c0_i32, %c0_i32_0 : i32, i32
  }
  func.func @transform_2(%arg0: i32) -> (i32, i32) {
    %c0_i32 = arith.constant 0 : i32
    %c0_i32_0 = arith.constant 0 : i32
    %c0_i32_1 = arith.constant 0 : i32
    return %c0_i32, %c0_i32_0 : i32, i32
  }
  func.func @transform_3(%arg0: i32) -> (i32, i32) {
    %c0_i32 = arith.constant 0 : i32
    %c0_i32_0 = arith.constant 0 : i32
    %c0_i32_1 = arith.constant 0 : i32
    return %c0_i32, %c0_i32_0 : i32, i32
  }
  func.func @transform_4(%arg0: i32) -> (i32, i32) {
    %c0_i32 = arith.constant 0 : i32
    %c0_i32_0 = arith.constant 0 : i32
    %c0_i32_1 = arith.constant 0 : i32
    return %c0_i32, %c0_i32_0 : i32, i32
  }
  func.func @transform_5(%arg0: i32) -> (i32, i32) {
    %c0_i32 = arith.constant 0 : i32
    %c0_i32_0 = arith.constant 0 : i32
    %c0_i32_1 = arith.constant 0 : i32
    return %c0_i32, %c0_i32_0 : i32, i32
  }
  func.func @transform_6(%arg0: i32) -> (i32, i32) {
    %c0_i32 = arith.constant 0 : i32
    %c0_i32_0 = arith.constant 0 : i32
    %c0_i32_1 = arith.constant 0 : i32
    return %c0_i32, %c0_i32_0 : i32, i32
  }
  func.func @transform_7(%arg0: i32) -> (i32, i32) {
    %c0_i32 = arith.constant 0 : i32
    %c0_i32_0 = arith.constant 0 : i32
    return %arg0, %c0_i32 : i32, i32
  }
}

</mosaic_0001>

<bundles_post_ra>
// kernel: tpu_custom_call.1
= control target key start
LH: loop header
LB: loop body
LE: loop exit
PB: predicated region body
PF: predicated region fallthrough
CT: control target
= control target key end

     0   :  { %s284_s0 = inlined_call_operand.vmem [shape: f32[8,32], index: 0, kind: input, shape index: {}]   ;;  %s285_s1 = inlined_call_operand.vmem [shape: f32[32,24], index: 1, kind: input, shape index: {}]   ;;  %s286_s2 = inlined_call_operand.vmem [shape: f32[1,24], index: 2, kind: input, shape index: {}]   ;;  %s287_s3 = inlined_call_operand.vmem [shape: f32[24,24], index: 3, kind: input, shape index: {}]   ;;  %s288_s4 = inlined_call_operand.vmem [shape: f32[1,24], index: 4, kind: input, shape index: {}]   ;;  %s289_s5 = inlined_call_operand.vmem [shape: f32[24,12], index: 5, kind: input, shape index: {}]   ;;  %s290_s6 = inlined_call_operand.vmem [shape: f32[1,12], index: 6, kind: input, shape index: {}]   ;;  %s291_s7 = inlined_call_operand.hbm [shape: f32[8,12], index: 7, kind: output, shape index: {}]  }
   0x1   :  { %v31_v0 = vld [vmem:[%s285_s1 + $0x18] sm:$0xff]  ;;  %v30_v1 = vld [vmem:[%s285_s1 + $0x10] sm:$0xff]  ;;  %v29_v2 = vld [vmem:[%s285_s1 + $0x8] sm:$0xff] }
   0x2   :  { %52 = vmatpush.msra.mxu0 %v31_v0 }
   0x4   :  { %53 = vmatpush.msra.mxu0 %v30_v1 }
   0x5   :  { %12 = vsyncpa [#allocation3], 0  ;;  %v28_v3 = vld [vmem:[%s285_s1] sm:$0xff]  ;;  %vm36_vm0 = vcmask 261120   ;;  %v63_v5 = vld [vmem:[%s287_s3 + $0x10] sm:$0xff]  ;;  %vm68_vm1 = vcmask 195584  }
   0x6   :  { %54 = vmatpush.msra.mxu0 %v29_v2  ;;  %v27_v4 = vld [vmem:[%s284_s0] sm:$0xff]  ;;  %85 = vmatpush.msra.mxu1 %v63_v5  ;;  %v62_v6 = vld [vmem:[%s287_s3 + $0x8] sm:$0xff]  ;;  %v95_v12 = vld [vmem:[%s289_s5 + $0x10] sm:$0xff]  ;;  %vm142_vm5 = vcmask 97280  }
   0x7   :  { %v61_v7 = vld [vmem:[%s287_s3] sm:$0xff]  ;;  %116 = vmatpush.msra.mxu2 %v95_v12  ;;  %v94_v13 = vld [vmem:[%s289_s5 + $0x8] sm:$0xff] }
   0x8   :  { %55 = vmatpush.msra.mxu0 %v28_v3  ;;  %86 = vmatpush.msra.mxu1 %v62_v6  ;;  %v165_v8 = vld [vmem:[%s286_s2] ss:$0 sm:$0xff] }
   0x9   :  { %160 = vmatmul.msk.f32.vlgmr.msra.gmra.mxu0 %vm36_vm0, %v27_v4  ;;  %117 = vmatpush.msra.mxu2 %v94_v13  ;;  %v93_v14 = vld [vmem:[%s289_s5] sm:$0xff] }
   0xa   :  { %87 = vmatpush.msra.mxu1 %v61_v7  ;;  %v166_v15 = vld [vmem:[%s288_s4] ss:$0 sm:$0xff]  ;;  %s198_s4 = smov [#allocation2]  }
   0xb   :  { %118 = vmatpush.msra.mxu2 %v93_v14  ;;  %v167_v19 = vld [vmem:[%s290_s6] ss:$0 sm:$0xff]  ;;  %s149_s5 = sshll.u32 %s198_s4, 4  ;;  %s151_s6 = sshll.u32 %s291_s7, 4  ;;  %s150_s5 = int_to_ptr.vmem [resolvable:$true] %s149_s5  ;;  %s152_s6 = int_to_ptr.hbm [resolvable:$true] %s151_s6 }
  0x86   :  { %v57_v9 = vpop.f32.mrf.mxu0 }
  0x87   :  { %v58_v10 = vadd.f32 %v165_v8, %v57_v9 }
  0x89   :  { %v60_v11 = vmax.f32 %v58_v10, 0.0 }
  0x8b   :  { %161 = vmatmul.msk.f32.vlgmr.msra.gmra.mxu1 %vm68_vm1, %v60_v11 }
 0x108   :  { %v89_v16 = vpop.f32.mrf.mxu1 }
 0x109   :  { %v90_v17 = vadd.f32 %v166_v15, %v89_v16 }
 0x10b   :  { %v92_v18 = vmax.f32 %v90_v17, 0.0 }
 0x10d   :  { %162 = vmatmul.msk.f32.vlgmr.msra.gmra.mxu2 %vm68_vm1, %v92_v18 }
 0x190   :  { %v120_v20 = vpop.f32.mrf.mxu2 }
 0x191   :  { %v121_v21 = vadd.f32 %v167_v19, %v120_v20 }
 0x193   :  { %v163_v22 = vmul.f32 -1.442695, %v121_v21 }
 0x195   :  { %168 = vpow2.f32 %v163_v22 }
 0x19b   :  { %v169_v23 = vpop.eup %168 }
 0x19c   :  { %v126_v24 = vadd.f32 1.0, %v169_v23 }
 0x19e   :  { %170 = vrcp.f32 %v126_v24  ;;  %v138_v28 = vand.u32 2147483648, %v126_v24  ;;  %v136_v30 = vand.u32 2147483647, %v126_v24  ;;  %vm132_vm3 = vweird.f32 %v126_v24 }
 0x1a0   :  { %v139_v32 = vor.u32 1.1754944e-38, %v138_v28  ;;  %vm137_vm6 = vcmp.eq.f32.partialorder %v136_v30, 8.507059e+37 }
 0x1a4   :  { %v171_v25 = vpop.eup %170 }
 0x1a5   :  { %v128_v26 = vmul.f32 %v171_v25, %v126_v24  ;;  %vm133_vm2 = vweird.f32 %v171_v25 }
 0x1a6   :  { %vm134_vm4 = vmor %vm132_vm3, %vm133_vm2 }
 0x1a7   :  { %v129_v27 = vsub.f32 1.0, %v128_v26 }
 0x1a9   :  { %v130_v29 = vmul.f32 %v171_v25, %v129_v27 }
 0x1ab   :  { %v131_v31 = vadd.f32 %v171_v25, %v130_v29 }
 0x1ad   :  { %v135_v33 = vsel %vm134_vm4, %v171_v25, %v131_v31 }
 0x1ae   :  { %v140_v34 = vsel %vm137_vm6, %v139_v32, %v135_v33 }
 0x1af   :  { %143 = vst.msk [vmem:[#allocation2] sm:$0xff] %vm142_vm5, %v140_v34 }
 0x1b0   :  { %154 = dma.vmem_to_hbm [thread:$0]  %s150_s5, 128, %s152_s6, [#allocation3]  }
 0x1b1   :  { %196 = dma.done.wait [#allocation3], 128  }
 0x1b2   :  { %197 = vsyncadd [#allocation3], 4294967168 }
 0x1b3   :  { %159 = vsyncpa [#allocation3], 1 }

</bundles_post_ra>
